<compile_context>
chip_gen: v7x
topology: tpu7x:2x2x1
jax: 0.10.0
libtpu: 0.0.40
codegen_flags: <defaults>
</compile_context>

<pallas_src>
import jax
import jax.numpy as jnp
from jax.experimental import pallas as pl
from jax.experimental.pallas import tpu as pltpu


def _clipper_kernel(b_ref, x_ref, o_ref):
    x = x_ref[...]
    boundary = b_ref[0]  # f32 scalar in SMEM (already rounded to x.dtype host-side)
    # torch: x = where(x > b, 0, x); x = where(x < 0, 0, x)  ->  one fused select.
    clip = (x > boundary) | (x < 0)
    o_ref[...] = jnp.where(clip, jnp.zeros_like(x), x)


def _chip_config():
    """Per-generation block-size / core-count / VMEM-limit defaults."""
    kind = ""
    try:
        dev = jax.devices()[0]
        if dev.platform == "tpu":
            kind = dev.device_kind.lower()
    except Exception:
        pass
    if "v7" in kind or "7x" in kind:
        # 8 MiB blocks -> 2x(8+8)=32 MiB of double-buffered pipeline VMEM, which
        # is exactly the default scoped limit, so raise it (64 MiB physical/TC).
        return {"block_bytes": 8 << 20, "num_cores": 2, "vmem_limit": 48 << 20}
    if "v6" in kind:
        # 4 MiB blocks -> 16 MiB pipeline VMEM, under the 32 MiB default limit.
        return {"block_bytes": 4 << 20, "num_cores": 1, "vmem_limit": None}
    if "v4" in kind or "v5p" in kind:
        # Megacore chips: keep blocks conservative, but feed both cores.
        return {"block_bytes": 2 << 20, "num_cores": 2, "vmem_limit": None}
    # v5e / unknown: 2 MiB blocks -> 8 MiB pipeline VMEM under 16 MiB default.
    return {"block_bytes": 2 << 20, "num_cores": 1, "vmem_limit": None}


def _choose_width(n):
    """Lane-dense width; prefer one dividing n so no pad/slice passes are needed."""
    for cand in (4096, 2048, 1024, 512, 256, 128):
        if n % cand == 0:
            return cand
    return 1024  # fallback: pad to a multiple of 1024 (rare)


def _choose_tiling(rows, width, itemsize, block_bytes, num_cores):
    """Pick (tile_rows, num_blocks) for the 1-D row grid."""
    sub = max(8, 32 // itemsize)          # sublane packing: 8 f32 / 16 bf16 / 32 int8
    bytes_per_row = width * itemsize
    total_bytes = rows * bytes_per_row

    # Upper bound on rows/block from the per-generation block-size target.
    max_tile_rows = max(sub, (block_bytes // bytes_per_row) // sub * sub)
    num_blocks = pl.cdiv(rows, max_tile_rows)

    # At least one block per TensorCore (so the "parallel" axis uses all cores),
    # and ~4 blocks/core when the tensor is big enough so in/out DMAs pipeline.
    min_blocks = num_cores if rows >= num_cores * sub else 1
    desired = 4 * num_cores
    if total_bytes >= desired * (512 << 10) and rows >= desired * sub:
        min_blocks = max(min_blocks, desired)
    num_blocks = max(num_blocks, min_blocks)
    if num_cores > 1 and rows >= num_cores * sub:
        # Even multiple of the core count avoids a tail-imbalance on small grids.
        num_blocks = pl.cdiv(num_blocks, num_cores) * num_cores

    tile_rows = pl.cdiv(pl.cdiv(rows, num_blocks), sub) * sub
    if tile_rows >= rows:
        tile_rows = rows               # full-extent block dim is always legal
    return tile_rows, pl.cdiv(rows, tile_rows)


def clipper(x, boundary, *, donate=False):
    """Elementwise Clipper: zero out values above `boundary` or below 0."""
    orig_shape = x.shape
    dtype = x.dtype
    n = x.size
    if n == 0:
        return x
    itemsize = jnp.dtype(dtype).itemsize
    cfg = _chip_config()

    width = _choose_width(n)
    x_flat = x.reshape(-1)
    n_pad = pl.cdiv(n, width) * width
    padded = n_pad != n
    if padded:
        # allow_input_fusion below folds this pad into the Pallas input DMA,
        # so the only extra HBM pass left on this (rare) path is the final slice.
        x_flat = jnp.pad(x_flat, (0, n_pad - n))
    rows = n_pad // width
    x2d = x_flat.reshape(rows, width)

    tile_rows, num_blocks = _choose_tiling(
        rows, width, itemsize, cfg["block_bytes"], cfg["num_cores"])

    # Round boundary to x.dtype (matches PyTorch's weak-scalar compare for
    # bf16/fp16), then store as f32 — SMEM scalars are 32-bit friendly and the
    # subsequent f32 compare classifies identically because the upcast is exact.
    if jnp.issubdtype(dtype, jnp.floating) and itemsize < 4:
        boundary_arr = jnp.asarray(boundary, dtype=dtype).astype(jnp.float32)
    else:
        boundary_arr = jnp.asarray(boundary, dtype=jnp.float32)
    boundary_arr = boundary_arr.reshape((1,))

    compiler_params = pltpu.CompilerParams(
        dimension_semantics=("parallel",),
        vmem_limit_bytes=cfg["vmem_limit"],
        # Let XLA fuse the pad producer of operand 1 (x2d) into the input DMA.
        allow_input_fusion=[False, True] if padded else None,
    )

    # Alias x2d to the output when the caller donates x (skip on the padded
    # path where the operand may already be a fusion result).
    io_aliases = {1: 0} if (donate and not padded) else {}

    # TODO(synk): if a v7x profile shows exposed DMA at block boundaries, try
    # pipeline_mode=pl.Buffered(3) on the x BlockSpec (sweep 2 vs 3).
    out2d = pl.pallas_call(
        _clipper_kernel,
        out_shape=jax.ShapeDtypeStruct((rows, width), dtype),
        grid_spec=pl.GridSpec(
            grid=(num_blocks,),
            in_specs=[
                pl.BlockSpec(memory_space=pltpu.MemorySpace.SMEM),  # boundary scalar
                pl.BlockSpec((tile_rows, width), lambda i: (i, 0)),
            ],
            out_specs=pl.BlockSpec((tile_rows, width), lambda i: (i, 0)),
        ),
        compiler_params=compiler_params,
        cost_estimate=pl.CostEstimate(
            flops=n, transcendentals=0, bytes_accessed=2 * n * itemsize),
        input_output_aliases=io_aliases,
    )(boundary_arr, x2d)

    out_flat = out2d.reshape(-1)
    if padded:
        out_flat = out_flat[:n]
    return out_flat.reshape(orig_shape)


if __name__ == "__main__":
    key = jax.random.PRNGKey(0)
    # Conv-activation-like shape: N=2, C=4, H=W=16 (divisible fast path).
    x = jax.random.normal(key, (2, 4, 16, 16), dtype=jnp.float32) * 2.0
    boundary = 1.0
    out = jax.block_until_ready(clipper(x, boundary))
    ref = jnp.where(x > boundary, 0.0, x)
    ref = jnp.where(ref < 0, 0.0, ref)
    assert jnp.allclose(out, ref), "mismatch vs reference (divisible path)"

    # Non-divisible / padded path (exercises allow_input_fusion + ragged rows).
    x2 = jax.random.normal(jax.random.PRNGKey(1), (3, 5, 37, 29), dtype=jnp.float32) * 2.0
    out2 = jax.block_until_ready(clipper(x2, 0.5))
    ref2 = jnp.where(x2 > 0.5, 0.0, x2)
    ref2 = jnp.where(ref2 < 0, 0.0, ref2)
    assert jnp.allclose(out2, ref2), "mismatch vs reference (padded path)"

    # bf16 path: boundary rounded to x.dtype on the host (PyTorch weak-scalar
    # compare semantics), kernel keeps x's dtype end to end.
    x3 = (jax.random.normal(jax.random.PRNGKey(2), (2, 4, 16, 16)) * 2.0).astype(jnp.bfloat16)
    out3 = jax.block_until_ready(clipper(x3, 1.0))
    ref3 = jnp.where(x3 > jnp.bfloat16(1.0), jnp.bfloat16(0.0), x3)
    ref3 = jnp.where(ref3 < 0, jnp.bfloat16(0.0), ref3)
    assert jnp.allclose(out3.astype(jnp.float32), ref3.astype(jnp.float32)), \
        "mismatch vs reference (bf16 path)"

    print("KERNEL_OK")
</pallas_src>

<mosaic_0001>
module attributes {stable_mosaic.version = 11 : i64} {
  func.func @_clipper_kernel(%arg0: i32, %arg1: memref<1xf32, #tpu.memory_space<smem>>, %arg2: memref<1x2048xf32, #tpu.memory_space<vmem>>, %arg3: memref<1x2048xf32, #tpu.memory_space<vmem>>) attributes {dimension_semantics = [#tpu.dimension_semantics<parallel>], iteration_bounds = array<i64: 1>, scalar_prefetch = 0 : i64, scratch_operands = 0 : i64, tpu.core_type = #tpu.core_type<tc>, window_params = [{transform_indices = @transform_0, window_bounds = array<i64: 1>}, {transform_indices = @transform_1, window_bounds = array<i64: 1, 2048>}, {transform_indices = @transform_2, window_bounds = array<i64: 1, 2048>}]} {
    %c0 = arith.constant 0 : index
    %c0_0 = arith.constant 0 : index
    %0 = vector.load %arg2[%c0, %c0_0] : memref<1x2048xf32, #tpu.memory_space<vmem>>, vector<1x2048xf32>
    %c0_1 = arith.constant 0 : index
    %1 = memref.load %arg1[%c0_1] : memref<1xf32, #tpu.memory_space<smem>>
    %2 = vector.broadcast %1 : f32 to vector<1x2048xf32>
    %3 = arith.cmpf ogt, %0, %2 : vector<1x2048xf32>
    %cst = arith.constant 0.000000e+00 : f32
    %4 = vector.broadcast %cst : f32 to vector<1x2048xf32>
    %5 = arith.cmpf olt, %0, %4 : vector<1x2048xf32>
    %6 = arith.ori %3, %5 : vector<1x2048xi1>
    %cst_2 = arith.constant 0.000000e+00 : f32
    %7 = vector.broadcast %cst_2 : f32 to vector<1x2048xf32>
    %8 = arith.select %6, %7, %0 : vector<1x2048xi1>, vector<1x2048xf32>
    %c0_3 = arith.constant 0 : index
    %c0_4 = arith.constant 0 : index
    %9 = vector.load %arg3[%c0_3, %c0_4] : memref<1x2048xf32, #tpu.memory_space<vmem>>, vector<1x2048xf32>
    tpu.vector_store %arg3[%c0_3, %c0_4], %8 {strides = array<i32>} : memref<1x2048xf32, #tpu.memory_space<vmem>>, vector<1x2048xf32>,
    return
  }
  func.func @transform_0(%arg0: i32) -> i32 {
    %c0_i32 = arith.constant 0 : i32
    %c0_i32_0 = arith.constant 0 : i32
    return %c0_i32 : i32
  }
  func.func @transform_1(%arg0: i32) -> (i32, i32) {
    %c0_i32 = arith.constant 0 : i32
    %c0_i32_0 = arith.constant 0 : i32
    return %arg0, %c0_i32 : i32, i32
  }
  func.func @transform_2(%arg0: i32) -> (i32, i32) {
    %c0_i32 = arith.constant 0 : i32
    %c0_i32_0 = arith.constant 0 : i32
    return %arg0, %c0_i32 : i32, i32
  }
}

</mosaic_0001>

<bundles_post_ra>
// kernel: tpu_custom_call.1
= control target key start
LH: loop header
LB: loop body
LE: loop exit
PB: predicated region body
PF: predicated region fallthrough
CT: control target
= control target key end

     0   :  { %8 = vsyncpa [#allocation4], 0  ;;  %s148_s0 = inlined_call_operand.<no memory space> [shape: f32[1], index: 0, kind: input, shape index: {}]   ;;  %s149_s1 = inlined_call_operand.hbm [shape: f32[1,2048], index: 1, kind: input, shape index: {}]   ;;  %s150_s2 = inlined_call_operand.hbm [shape: f32[1,2048], index: 2, kind: output, shape index: {}]  }
   0x1   :  { %9 = vsyncpa [#allocation5], 0  ;;  %s104_s9 = smov [#allocation3]   ;;  %s56_s13 = scalar_lea.hbm %s149_s1, 256 }
   0x2   :  { %s18_s10 = sshll.u32 %s104_s9, 4  ;;  %p57_p0 = scmp.ne.s32.totalorder %s149_s1, %s56_s13  ;;  %s19_s10 = int_to_ptr.vmem [resolvable:$true] %s18_s10 }
   0x3   :  { %p60_p1 = scmp.lt.u32.totalorder %s56_s13, %s149_s1 }
   0x5   :  { %p62_p2 = pnand %p60_p1, %p57_p0 }
   0x7   :  { %65 = shalt.err (!%p62_p2)
}
   0x8   :  { %s66_s18 = scalar_lea.vmem %s19_s10, 256  ;;  %p71_p4 = scmp.lt.s32.totalorder %s19_s10, %s19_s10 }
   0x9   :  { %p67_p3 = scmp.ne.s32.totalorder %s19_s10, %s66_s18  ;;  %p72_p5 = scmp.lt.s32.totalorder %s66_s18, %s66_s18 }
   0xb   :  { %p73_p6 = por %p72_p5, %p71_p4 }
   0xd   :  { %p74_p7 = pnand %p73_p6, %p67_p3 }
   0xf   :  { %77 = shalt.err (!%p74_p7)
}
  0x10   :  { %21 = dma.hbm_to_vmem [thread:$0]  %s149_s1, 256, %s19_s10, [#allocation4]  }
  0x11   :  { %100 = dma.done.wait [#allocation4], 256  }
  0x12   :  { %101 = vsyncadd [#allocation4], 4294967040  ;;  %v28_v0 = vstv %s148_s0  ;;  %v25_v1 = vld [vmem:[#allocation3] sm:$0xff]  ;;  %v26_v2 = vld [vmem:[#allocation3 + $0x8] sm:$0xff]  ;;  %s105_s23 = smov [#allocation6]  }
  0x13   :  { %s45_s24 = sshll.u32 %s105_s23, 4  ;;  %vm29_vm0 = vcmp.gt.f32.partialorder %v25_v1, %v28_v0  ;;  %vm31_vm1 = vcmp.lt.f32.partialorder %v25_v1, 0.0  ;;  %vm30_vm2 = vcmp.gt.f32.partialorder %v26_v2, %v28_v0  ;;  %vm32_vm3 = vcmp.lt.f32.partialorder %v26_v2, 0.0  ;;  %s46_s24 = int_to_ptr.vmem [resolvable:$true] %s45_s24 }
  0x14   :  { %vm33_vm4 = vmor %vm29_vm0, %vm31_vm1  ;;  %s78_s1 = scalar_lea.vmem %s46_s24, 256  ;;  %p83_p9 = scmp.lt.s32.totalorder %s46_s24, %s46_s24 }
  0x15   :  { %v35_v3 = vsel %vm33_vm4, 0.0, %v25_v1  ;;  %vm34_vm5 = vmor %vm30_vm2, %vm32_vm3  ;;  %p79_p8 = scmp.ne.s32.totalorder %s46_s24, %s78_s1  ;;  %p84_p10 = scmp.lt.s32.totalorder %s78_s1, %s78_s1 }
  0x16   :  { %37 = vst [vmem:[#allocation6] sm:$0xff] %v35_v3  ;;  %v36_v4 = vsel %vm34_vm5, 0.0, %v26_v2 }
  0x17   :  { %38 = vst [vmem:[#allocation6 + $0x8] sm:$0xff] %v36_v4  ;;  %p85_p11 = por %p84_p10, %p83_p9 }
  0x19   :  { %p86_p12 = pnand %p85_p11, %p79_p8 }
  0x1b   :  { %89 = shalt.err (!%p86_p12)
}
  0x1c   :  { %s90_s26 = scalar_lea.hbm %s150_s2, 256 }
  0x1d   :  { %p91_p13 = scmp.ne.s32.totalorder %s150_s2, %s90_s26  ;;  %p94_p0 = scmp.lt.u32.totalorder %s90_s26, %s150_s2 }
  0x1f   :  { %p96_p1 = pnand %p94_p0, %p91_p13 }
  0x21   :  { %99 = shalt.err (!%p96_p1)
}
  0x22   :  { %48 = dma.vmem_to_hbm [thread:$0]  %s46_s24, 256, %s150_s2, [#allocation5]  }
  0x23   :  { %102 = dma.done.wait [#allocation5], 256  }
  0x24   :  { %103 = vsyncadd [#allocation5], 4294967040 }
  0x25   :  { %52 = vsyncpa [#allocation4], 1 }
  0x26   :  { %53 = vsyncpa [#allocation5], 1 }

</bundles_post_ra>
